<compile_context>
chip_gen: v6e
topology: v6e:2x2x1
jax: 0.10.0
libtpu: 0.0.40
codegen_flags: <defaults>
</compile_context>

<pallas_src>
import functools

import jax
import jax.numpy as jnp
from jax.experimental import pallas as pl
from jax.experimental.pallas import tpu as pltpu


def _round_up(v, m):
    return (v + m - 1) // m * m


def _lrd_kernel(*refs, p):
    if p > 0.0:
        x_ref, w_ref, b_ref, r_ref, o_ref, acc_ref = refs
    else:
        x_ref, w_ref, b_ref, o_ref, acc_ref = refs

    k = pl.program_id(2)

    @pl.when(k == 0)
    def _():
        acc_ref[...] = jnp.zeros_like(acc_ref)

    # x tile (tm, tk) contracted with weight tile (tn, tk) over K -> (tm, tn).
    # Contracting on the shared K dim avoids any weight transpose in HBM.
    acc_ref[...] += jax.lax.dot_general(
        x_ref[...], w_ref[...],
        dimension_numbers=(((1,), (1,)), ((), ())),
        preferred_element_type=jnp.float32)

    # Epilogue (bias + ReLU + inverted dropout) only on the last K step,
    # all in float32 on the VPU.
    @pl.when(k == pl.num_programs(2) - 1)
    def _():
        y = acc_ref[...] + b_ref[...].astype(jnp.float32)
        y = jnp.maximum(y, 0.0)
        if p > 0.0:
            keep_prob = 1.0 - p
            thresh = jnp.uint32(min(int(round(keep_prob * 2.0 ** 32)),
                                    2 ** 32 - 1))
            keep = r_ref[...] < thresh
            y = jnp.where(keep, y * (1.0 / keep_prob), 0.0)
        o_ref[...] = y.astype(o_ref.dtype)


def linear_relu_dropout(x, weight, bias, *, p, key=None, training=True,
                        tm=256, tn=512, tk=512, mxu_dtype=None):
    """x: (M, K) f32; weight: (N, K) PyTorch Linear layout; bias: (N,).

    Returns dropout(relu(x @ weight.T + bias), p) with inverted-dropout
    scaling 1/(1-p). Pass `mxu_dtype=jnp.bfloat16` to feed the MXU in bf16
    (epilogue stays f32); default keeps full f32 semantics.
    """
    M, K = x.shape
    N, Kw = weight.shape
    assert Kw == K and bias.shape == (N,)

    p_eff = float(p) if training else 0.0
    if p_eff > 0.0 and key is None:
        raise ValueError("training dropout (p > 0) requires a PRNG `key`")

    # Tile sizes: clamp to the (padded) problem; last block dims are either a
    # multiple of 128 (lane-dense) or the full extent, second-to-last a
    # multiple of 8.
    tm = min(tm, _round_up(M, 8))
    tn = min(tn, _round_up(N, 128))
    if K <= tk:
        tk = K
    else:
        tk = _round_up(tk, 128)
    Mp, Np, Kp = _round_up(M, tm), _round_up(N, tn), _round_up(K, tk)

    x_p = x if (Mp, Kp) == (M, K) else jnp.pad(x, ((0, Mp - M), (0, Kp - K)))
    w_p = weight if (Np, Kp) == (N, K) else jnp.pad(
        weight, ((0, Np - N), (0, Kp - K)))
    b_p = (bias if Np == N else jnp.pad(bias, (0, Np - N)))
    b_p = b_p.reshape(1, Np).astype(jnp.float32)

    if mxu_dtype is not None:             # e.g. jnp.bfloat16 on v6e / v7x
        x_p = x_p.astype(mxu_dtype)
        w_p = w_p.astype(mxu_dtype)

    grid = (Mp // tm, Np // tn, Kp // tk)

    in_specs = [
        pl.BlockSpec((tm, tk), lambda i, j, k: (i, k)),   # x row / K tile
        pl.BlockSpec((tn, tk), lambda i, j, k: (j, k)),   # weight (N, K) tile
        pl.BlockSpec((1, tn), lambda i, j, k: (0, j)),    # bias slice
    ]
    operands = [x_p, w_p, b_p]

    if p_eff > 0.0:
        # Tiling-independent dropout bits generated once per call.
        bits = jax.random.bits(key, (Mp, Np), dtype=jnp.uint32)
        in_specs.append(pl.BlockSpec((tm, tn), lambda i, j, k: (i, j)))
        operands.append(bits)

    kernel = functools.partial(_lrd_kernel, p=p_eff)

    out = pl.pallas_call(
        kernel,
        out_shape=jax.ShapeDtypeStruct((Mp, Np), x.dtype),
        grid_spec=pltpu.PrefetchScalarGridSpec(
            num_scalar_prefetch=0,
            grid=grid,
            in_specs=in_specs,
            out_specs=pl.BlockSpec((tm, tn), lambda i, j, k: (i, j)),
            scratch_shapes=[pltpu.VMEM((tm, tn), jnp.float32)]),
        compiler_params=pltpu.CompilerParams(
            dimension_semantics=("parallel", "parallel", "arbitrary")),
    )(*operands)

    return out[:M, :N] if (Mp, Np) != (M, N) else out


if __name__ == "__main__":
    # Small shapes consistent with the module: n_in=32, n_out=64, batch=16.
    M, n_in, n_out = 16, 32, 64
    p = 0.1

    root = jax.random.PRNGKey(0)
    kx, kw, kb, kd = jax.random.split(root, 4)

    x = jax.random.normal(kx, (M, n_in), dtype=jnp.float32)
    # Deterministic PyTorch-like Linear init (uniform in +/- 1/sqrt(n_in)).
    bound = 1.0 / (n_in ** 0.5)
    weight = jax.random.uniform(kw, (n_out, n_in), jnp.float32, -bound, bound)
    bias = jax.random.uniform(kb, (n_out,), jnp.float32, -bound, bound)

    out = linear_relu_dropout(x, weight, bias, p=p, key=kd, training=True)
    out = jax.block_until_ready(out)

    ref = jnp.maximum(x @ weight.T + bias, 0.0)
    assert out.shape == (M, n_out)
    assert bool(jnp.all(out >= 0.0))
    kept = out > 0.0
    assert bool(jnp.allclose(out[kept], (ref / (1.0 - p))[kept], atol=1e-5))

    # Eval mode (dropout disabled) must exactly match relu(linear).
    out_eval = linear_relu_dropout(x, weight, bias, p=p, key=kd,
                                   training=False)
    out_eval = jax.block_until_ready(out_eval)
    assert bool(jnp.allclose(out_eval, ref, atol=1e-5))

    print("KERNEL_OK")
</pallas_src>

<mosaic_0001>
module attributes {stable_mosaic.version = 11 : i64} {
  func.func @_lrd_kernel(%arg0: i32, %arg1: i32, %arg2: i32, %arg3: memref<16x32xf32, #tpu.memory_space<vmem>>, %arg4: memref<128x32xf32, #tpu.memory_space<vmem>>, %arg5: memref<1x128xf32, #tpu.memory_space<vmem>>, %arg6: memref<16x128xi32, #tpu.memory_space<vmem>>, %arg7: memref<16x128xf32, #tpu.memory_space<vmem>>, %arg8: memref<16x128xf32, #tpu.memory_space<vmem>>) attributes {dimension_semantics = [#tpu.dimension_semantics<parallel>, #tpu.dimension_semantics<parallel>, #tpu.dimension_semantics<arbitrary>], iteration_bounds = array<i64: 1, 1, 1>, scalar_prefetch = 0 : i64, scratch_operands = 1 : i64, tpu.core_type = #tpu.core_type<tc>, window_params = [{transform_indices = @transform_0, window_bounds = array<i64: 16, 32>}, {transform_indices = @transform_1, window_bounds = array<i64: 128, 32>}, {transform_indices = @transform_2, window_bounds = array<i64: 1, 128>}, {transform_indices = @transform_3, window_bounds = array<i64: 16, 128>}, {transform_indices = @transform_4, window_bounds = array<i64: 16, 128>}]} {
    %c0_i32 = arith.constant 0 : i32
    %0 = arith.cmpi eq, %arg2, %c0_i32 : i32
    %1 = arith.extui %0 : i1 to i32
    %c0_i32_0 = arith.constant 0 : i32
    %2 = arith.cmpi ne, %1, %c0_i32_0 : i32
    scf.if %2 {
      %cst_10 = arith.constant 0.000000e+00 : f32
      %12 = vector.broadcast %cst_10 : f32 to vector<16x128xf32>
      %c0_11 = arith.constant 0 : index
      %c0_12 = arith.constant 0 : index
      %13 = vector.load %arg8[%c0_11, %c0_12] : memref<16x128xf32, #tpu.memory_space<vmem>>, vector<16x128xf32>
      tpu.vector_store %arg8[%c0_11, %c0_12], %12 {strides = array<i32>} : memref<16x128xf32, #tpu.memory_space<vmem>>, vector<16x128xf32>,
    } else {
    }
    %c0 = arith.constant 0 : index
    %c0_1 = arith.constant 0 : index
    %3 = vector.load %arg8[%c0, %c0_1] : memref<16x128xf32, #tpu.memory_space<vmem>>, vector<16x128xf32>
    %c0_2 = arith.constant 0 : index
    %c0_3 = arith.constant 0 : index
    %4 = vector.load %arg3[%c0_2, %c0_3] : memref<16x32xf32, #tpu.memory_space<vmem>>, vector<16x32xf32>
    %c0_4 = arith.constant 0 : index
    %c0_5 = arith.constant 0 : index
    %5 = vector.load %arg4[%c0_4, %c0_5] : memref<128x32xf32, #tpu.memory_space<vmem>>, vector<128x32xf32>
    %cst = arith.constant dense<0.000000e+00> : vector<16x128xf32>
    %6 = tpu.matmul %4, %5, %cst {dimension_numbers = #tpu.dot_dimension_numbers<[1], [1], [0], [0], [0, 0, 1, 0], [], []>} : vector<16x32xf32>, vector<128x32xf32>, vector<16x128xf32> -> vector<16x128xf32>
    %7 = arith.addf %3, %6 : vector<16x128xf32>
    %c0_6 = arith.constant 0 : index
    %c0_7 = arith.constant 0 : index
    %8 = vector.load %arg8[%c0_6, %c0_7] : memref<16x128xf32, #tpu.memory_space<vmem>>, vector<16x128xf32>
    tpu.vector_store %arg8[%c0_6, %c0_7], %7 {strides = array<i32>} : memref<16x128xf32, #tpu.memory_space<vmem>>, vector<16x128xf32>,
    %c0_i32_8 = arith.constant 0 : i32
    %9 = arith.cmpi eq, %arg2, %c0_i32_8 : i32
    %10 = arith.extui %9 : i1 to i32
    %c0_i32_9 = arith.constant 0 : i32
    %11 = arith.cmpi ne, %10, %c0_i32_9 : i32
    scf.if %11 {
      %c0_10 = arith.constant 0 : index
      %c0_11 = arith.constant 0 : index
      %12 = vector.load %arg8[%c0_10, %c0_11] : memref<16x128xf32, #tpu.memory_space<vmem>>, vector<16x128xf32>
      %c0_12 = arith.constant 0 : index
      %c0_13 = arith.constant 0 : index
      %13 = vector.load %arg5[%c0_12, %c0_13] : memref<1x128xf32, #tpu.memory_space<vmem>>, vector<1x128xf32>
      %14 = vector.broadcast %13 : vector<1x128xf32> to vector<16x128xf32>
      %15 = arith.addf %12, %14 : vector<16x128xf32>
      %cst_14 = arith.constant 0.000000e+00 : f32
      %16 = vector.broadcast %cst_14 : f32 to vector<16x128xf32>
      %17 = arith.maximumf %15, %16 : vector<16x128xf32>
      %c0_15 = arith.constant 0 : index
      %c0_16 = arith.constant 0 : index
      %18 = vector.load %arg6[%c0_15, %c0_16] : memref<16x128xi32, #tpu.memory_space<vmem>>, vector<16x128xi32>
      %c-429496730_i32 = arith.constant -429496730 : i32
      %19 = vector.broadcast %c-429496730_i32 : i32 to vector<16x128xi32>
      %20 = arith.cmpi ult, %18, %19 : vector<16x128xi32>
      %cst_17 = arith.constant 1.11111116 : f32
      %21 = vector.broadcast %cst_17 : f32 to vector<16x128xf32>
      %22 = arith.mulf %17, %21 : vector<16x128xf32>
      %cst_18 = arith.constant 0.000000e+00 : f32
      %23 = vector.broadcast %cst_18 : f32 to vector<16x128xf32>
      %24 = arith.select %20, %22, %23 : vector<16x128xi1>, vector<16x128xf32>
      %c0_19 = arith.constant 0 : index
      %c0_20 = arith.constant 0 : index
      %25 = vector.load %arg7[%c0_19, %c0_20] : memref<16x128xf32, #tpu.memory_space<vmem>>, vector<16x128xf32>
      tpu.vector_store %arg7[%c0_19, %c0_20], %24 {strides = array<i32>} : memref<16x128xf32, #tpu.memory_space<vmem>>, vector<16x128xf32>,
    } else {
    }
    return
  }
  func.func @transform_0(%arg0: i32, %arg1: i32, %arg2: i32) -> (i32, i32) {
    %c0_i32 = arith.constant 0 : i32
    return %arg0, %arg2 : i32, i32
  }
  func.func @transform_1(%arg0: i32, %arg1: i32, %arg2: i32) -> (i32, i32) {
    %c0_i32 = arith.constant 0 : i32
    return %arg1, %arg2 : i32, i32
  }
  func.func @transform_2(%arg0: i32, %arg1: i32, %arg2: i32) -> (i32, i32) {
    %c0_i32 = arith.constant 0 : i32
    %c0_i32_0 = arith.constant 0 : i32
    return %c0_i32, %arg1 : i32, i32
  }
  func.func @transform_3(%arg0: i32, %arg1: i32, %arg2: i32) -> (i32, i32) {
    %c0_i32 = arith.constant 0 : i32
    return %arg0, %arg1 : i32, i32
  }
  func.func @transform_4(%arg0: i32, %arg1: i32, %arg2: i32) -> (i32, i32) {
    %c0_i32 = arith.constant 0 : i32
    return %arg0, %arg1 : i32, i32
  }
}

</mosaic_0001>

<bundles_post_ra>
// kernel: tpu_custom_call.1
= control target key start
LH: loop header
LB: loop body
LE: loop exit
PB: predicated region body
PF: predicated region fallthrough
CT: control target
= control target key end

     0   :  { %vm44_vm0 = vcmask 261120   ;;  %s445_s0 = inlined_call_operand.vmem [shape: f32[16,32], index: 0, kind: input, shape index: {}]   ;;  %s446_s1 = inlined_call_operand.vmem [shape: f32[128,32], index: 1, kind: input, shape index: {}]   ;;  %s447_s2 = inlined_call_operand.vmem [shape: f32[1,128], index: 2, kind: input, shape index: {}]   ;;  %s448_s3 = inlined_call_operand.vmem [shape: u32[16,128], index: 3, kind: input, shape index: {}]   ;;  %s449_s4 = inlined_call_operand.hbm [shape: f32[16,128], index: 4, kind: output, shape index: {}]  }
   0x1   :  { %v43_v0 = vld [vmem:[%s446_s1 + $0x78] sm:$0xff]  ;;  %v42_v1 = vld [vmem:[%s446_s1 + $0x70] sm:$0xff]  ;;  %v41_v2 = vld [vmem:[%s446_s1 + $0x68] sm:$0xff] }
   0x2   :  { %257 = vmatprep.subr.msk.mxu0 %vm44_vm0, %v43_v0  ;;  %v26_v3 = vld [vmem:[%s445_s0] sm:$0xff] }
   0x3   :  { %258 = vmatpush3.xpose.msk.msra.mxu0 %vm44_vm0, %v43_v0  ;;  %289 = vmatprep.mubr.msk.f32.mxu0 %vm44_vm0, %v26_v3 }
   0x4   :  { %259 = vmatprep.subr.msk.mxu0 %vm44_vm0, %v42_v1 }
   0x7   :  { %260 = vmatpush3.xpose.msk.msra.mxu0 %vm44_vm0, %v42_v1 }
   0x8   :  { %9 = vsyncpa [#allocation4], 0  ;;  %261 = vmatprep.subr.msk.mxu0 %vm44_vm0, %v41_v2  ;;  %v40_v4 = vld [vmem:[%s446_s1 + $0x60] sm:$0xff]  ;;  %v39_v5 = vld [vmem:[%s446_s1 + $0x58] sm:$0xff] }
   0x9   :  { %v38_v6 = vld [vmem:[%s446_s1 + $0x50] sm:$0xff]  ;;  %v37_v7 = vld [vmem:[%s446_s1 + $0x48] sm:$0xff]  ;;  %v36_v8 = vld [vmem:[%s446_s1 + $0x40] sm:$0xff] }
   0xa   :  { %v35_v9 = vld [vmem:[%s446_s1 + $0x38] sm:$0xff]  ;;  %v34_v10 = vld [vmem:[%s446_s1 + $0x30] sm:$0xff]  ;;  %v33_v11 = vld [vmem:[%s446_s1 + $0x28] sm:$0xff] }
   0xb   :  { %262 = vmatpush3.xpose.msk.msra.mxu0 %vm44_vm0, %v41_v2  ;;  %v32_v12 = vld [vmem:[%s446_s1 + $0x20] sm:$0xff]  ;;  %v31_v13 = vld [vmem:[%s446_s1 + $0x18] sm:$0xff]  ;;  %v30_v14 = vld [vmem:[%s446_s1 + $0x10] sm:$0xff] }
   0xc   :  { %263 = vmatprep.subr.msk.mxu0 %vm44_vm0, %v40_v4  ;;  %v29_v15 = vld [vmem:[%s446_s1 + $0x8] sm:$0xff]  ;;  %v28_v16 = vld [vmem:[%s446_s1] sm:$0xff] }
   0xd   :  { %v27_v17 = vld [vmem:[%s445_s0 + $0x8] sm:$0xff]  ;;  %v238_v18 = vld [vmem:[%s447_s2] ss:$0 sm:$0xff]  ;;  %s317_s0 = smov [#allocation3]  }
   0xe   :  { %v195_v21 = vld [vmem:[%s448_s3 + $0x8] sm:$0xff]  ;;  %v194_v25 = vld [vmem:[%s448_s3] sm:$0xff]  ;;  %s209_s30 = sshll.u32 %s317_s0, 4  ;;  %s210_s30 = int_to_ptr.vmem [resolvable:$true] %s209_s30 }
   0xf   :  { %264 = vmatpush3.xpose.msk.msra.mxu0 %vm44_vm0, %v40_v4  ;;  %vm197_vm1 = vcmp.lt.u32.totalorder %v195_v21, 3865470566  ;;  %vm196_vm2 = vcmp.lt.u32.totalorder %v194_v25, 3865470566  ;;  %s295_s2 = scalar_lea.vmem %s210_s30, 256  ;;  %p300_p1 = scmp.lt.s32.totalorder %s210_s30, %s210_s30 }
  0x10   :  { %265 = vmatprep.subr.msk.mxu0 %vm44_vm0, %v39_v5  ;;  %p296_p0 = scmp.ne.s32.totalorder %s210_s30, %s295_s2  ;;  %p301_p2 = scmp.lt.s32.totalorder %s295_s2, %s295_s2 }
  0x12   :  { %p302_p3 = por %p301_p2, %p300_p1 }
  0x13   :  { %266 = vmatpush3.xpose.msk.msra.mxu0 %vm44_vm0, %v39_v5 }
  0x14   :  { %267 = vmatprep.subr.msk.mxu0 %vm44_vm0, %v38_v6  ;;  %p303_p4 = pnand %p302_p3, %p296_p0 }
  0x17   :  { %268 = vmatpush3.xpose.msk.msra.mxu0 %vm44_vm0, %v38_v6 }
  0x18   :  { %269 = vmatprep.subr.msk.mxu0 %vm44_vm0, %v37_v7 }
  0x1b   :  { %270 = vmatpush3.xpose.msk.msra.mxu0 %vm44_vm0, %v37_v7 }
  0x1c   :  { %271 = vmatprep.subr.msk.mxu0 %vm44_vm0, %v36_v8 }
  0x1f   :  { %272 = vmatpush3.xpose.msk.msra.mxu0 %vm44_vm0, %v36_v8 }
  0x20   :  { %273 = vmatprep.subr.msk.mxu0 %vm44_vm0, %v35_v9 }
  0x23   :  { %274 = vmatpush3.xpose.msk.msra.mxu0 %vm44_vm0, %v35_v9 }
  0x24   :  { %275 = vmatprep.subr.msk.mxu0 %vm44_vm0, %v34_v10 }
  0x27   :  { %276 = vmatpush3.xpose.msk.msra.mxu0 %vm44_vm0, %v34_v10 }
  0x28   :  { %277 = vmatprep.subr.msk.mxu0 %vm44_vm0, %v33_v11 }
  0x2b   :  { %278 = vmatpush3.xpose.msk.msra.mxu0 %vm44_vm0, %v33_v11 }
  0x2c   :  { %279 = vmatprep.subr.msk.mxu0 %vm44_vm0, %v32_v12 }
  0x2f   :  { %280 = vmatpush3.xpose.msk.msra.mxu0 %vm44_vm0, %v32_v12 }
  0x30   :  { %281 = vmatprep.subr.msk.mxu0 %vm44_vm0, %v31_v13 }
  0x33   :  { %282 = vmatpush3.xpose.msk.msra.mxu0 %vm44_vm0, %v31_v13 }
  0x34   :  { %283 = vmatprep.subr.msk.mxu0 %vm44_vm0, %v30_v14 }
  0x37   :  { %284 = vmatpush3.xpose.msk.msra.mxu0 %vm44_vm0, %v30_v14 }
  0x38   :  { %285 = vmatprep.subr.msk.mxu0 %vm44_vm0, %v29_v15 }
  0x3b   :  { %286 = vmatpush3.xpose.msk.msra.mxu0 %vm44_vm0, %v29_v15 }
  0x3c   :  { %287 = vmatprep.subr.msk.mxu0 %vm44_vm0, %v28_v16 }
  0x3f   :  { %288 = vmatpush3.xpose.msk.msra.mxu0 %vm44_vm0, %v28_v16 }
  0x42   :  { %290 = vmatmul.mubr.msk.f32.vlgmr.msra.gmra.mxu0 %vm44_vm0, %v27_v17 }
 0x102   :  { %v291_v19 = vpop.f32.mrf.mxu0 }
 0x103   :  { %v191_v20 = vadd.f32 %v291_v19, %v238_v18 }
 0x104   :  { %v165_v22 = vpop.f32.mrf.mxu0 }
 0x105   :  { %v193_v23 = vmax.f32 %v191_v20, 0.0  ;;  %v190_v24 = vadd.f32 %v238_v18, %v165_v22 }
 0x107   :  { %v199_v26 = vmul.f32 1.1111112, %v193_v23  ;;  %v192_v27 = vmax.f32 %v190_v24, 0.0 }
 0x109   :  { %v201_v28 = vsel %vm197_vm1, %v199_v26, 0.0  ;;  %v198_v29 = vmul.f32 1.1111112, %v192_v27 }
 0x10a   :  { %203 = vst [vmem:[#allocation3 + $0x8] sm:$0xff] %v201_v28 }
 0x10b   :  { %v200_v30 = vsel %vm196_vm2, %v198_v29, 0.0 }
 0x10c   :  { %202 = vst [vmem:[#allocation3] sm:$0xff] %v200_v30 }
 0x10d   :  { %306 = shalt.err (!%p303_p4)
}
 0x10e   :  { %s318_s3 = smov 128   ;;  %s319_s5 = smov 8  }
 0x10f   :  { %215 = dma.vmem_to_hbm [thread:$0]  %s210_s30, 256, %s449_s4, [#allocation4], %s318_s3, %s318_s3, %s319_s5  }
 0x110   :  { %315 = dma.done.wait [#allocation4], 256  }
 0x111   :  { %316 = vsyncadd [#allocation4], 4294967040 }
 0x112   :  { %219 = vsyncpa [#allocation4], 1 }

</bundles_post_ra>
